<compile_context>
chip_gen: v7x
topology: tpu7x:2x2x1
jax: 0.10.0
libtpu: 0.0.40
codegen_flags: <defaults>
</compile_context>

<pallas_src>
import jax
import jax.numpy as jnp
from jax.experimental import pallas as pl
from jax.experimental.pallas import tpu as pltpu

HIDDEN = 128
SUBLANE_BF16 = 16  # bf16 packs 2 rows per sublane -> keep row tiles % 16 == 0


def _round_up(n, m):
    return (n + m - 1) // m * m


def dqn_kernel(x_ref, w1_ref, b1_ref, w2_ref, b2_ref, w3_ref, b3_ref, o_ref):
    out_dim = o_ref.shape[-1]
    # fc1 + ReLU.  x arrives as raw f32 and is cast to bf16 in-kernel (VPU work
    # hidden under the DMA); K = input_dim (<128) is fine for the MXU lowering.
    x = x_ref[...].astype(jnp.bfloat16)
    h = jnp.dot(x, w1_ref[...], preferred_element_type=jnp.float32)
    h = jnp.maximum(h + b1_ref[...], 0.0)
    # fc2 + ReLU (bf16 operands on the MXU, f32 accumulation; epilogue in f32).
    h = jnp.dot(h.astype(jnp.bfloat16), w2_ref[...],
                preferred_element_type=jnp.float32)
    h = jnp.maximum(h + b2_ref[...], 0.0)
    # fc3: lane-dense 128x128 matmul, then compact to the real action columns
    # before the store so the HBM write is (tb, out_dim) instead of (tb, 128).
    q = jnp.dot(h.astype(jnp.bfloat16), w3_ref[...],
                preferred_element_type=jnp.float32)
    o_ref[...] = (q[:, :out_dim] + b3_ref[...]).astype(o_ref.dtype)


def dqn_forward(x, params, *, batch_tile=4096):
    """x: [B, input_dim] float32 -> Q-values [B, output_dim] float32."""
    w1, b1 = params["w1"], params["b1"]
    w2, b2 = params["w2"], params["b2"]
    w3, b3 = params["w3"], params["b3"]

    B, in_dim = x.shape
    hidden = w1.shape[1]
    out_dim = b3.shape[-1]

    # Batch tiling: multiple of 16 (bf16 sublane packing), large enough to
    # amortize per-grid-step overhead, and >=2 grid steps when possible so the
    # "parallel" batch axis can be sharded across both TensorCores on v7x.
    b_req = _round_up(B, SUBLANE_BF16)
    tb = max(SUBLANE_BF16,
             min(batch_tile, _round_up(pl.cdiv(b_req, 2), SUBLANE_BF16)))
    b_pad = _round_up(b_req, tb)
    if b_pad != B:
        x = jnp.pad(x, ((0, b_pad - B), (0, 0)))
    grid = (b_pad // tb,)

    resident = lambda arr: pl.BlockSpec(arr.shape, lambda i: (0, 0))

    # Advisory cost hint so XLA can schedule surrounding replay-buffer work.
    flops = 2 * b_pad * (in_dim * hidden + hidden * hidden + hidden * w3.shape[1])
    bytes_accessed = (
        b_pad * in_dim * 4 + b_pad * out_dim * 4
        + sum(int(a.size) * a.dtype.itemsize for a in (w1, b1, w2, b2, w3, b3)))
    cost = pl.CostEstimate(flops=int(flops), transcendentals=0,
                           bytes_accessed=int(bytes_accessed))

    out = pl.pallas_call(
        dqn_kernel,
        out_shape=jax.ShapeDtypeStruct((b_pad, out_dim), jnp.float32),
        grid=grid,
        in_specs=[
            pl.BlockSpec((tb, in_dim), lambda i: (i, 0)),   # x: batch-tiled raw f32
            resident(w1), resident(b1),                     # weights stay in VMEM
            resident(w2), resident(b2),
            resident(w3), resident(b3),
        ],
        out_specs=pl.BlockSpec((tb, out_dim), lambda i: (i, 0)),  # compact output
        compiler_params=pltpu.CompilerParams(
            dimension_semantics=("parallel",),
            vmem_limit_bytes=32 * 1024 * 1024),
        cost_estimate=cost,
    )(x, w1, b1, w2, b2, w3, b3)

    return out if b_pad == B else out[:B]


def init_dqn_params(key, input_dim, output_dim, hidden=HIDDEN):
    """Synthetic parameters (Kaiming-uniform-ish, like nn.Linear defaults).

    Weights are stored [in, out] (transpose of PyTorch's [out, in]) in bf16 for
    the MXU; biases are f32 row vectors.  w3's columns are zero-padded to
    `hidden` lanes so the fc3 matmul is lane-dense, but the padded columns
    never reach HBM (the kernel compacts before the store)."""
    ks = jax.random.split(key, 6)

    def lin(kw, kb, fan_in, fan_out, out_alloc=None):
        out_alloc = fan_out if out_alloc is None else out_alloc
        bound = 1.0 / (fan_in ** 0.5)
        w = jax.random.uniform(kw, (fan_in, fan_out), jnp.float32, -bound, bound)
        b = jax.random.uniform(kb, (1, fan_out), jnp.float32, -bound, bound)
        if out_alloc != fan_out:
            w = jnp.pad(w, ((0, 0), (0, out_alloc - fan_out)))
        return w.astype(jnp.bfloat16), b  # biases stay f32

    w1, b1 = lin(ks[0], ks[1], input_dim, hidden)
    w2, b2 = lin(ks[2], ks[3], hidden, hidden)
    w3, b3 = lin(ks[4], ks[5], hidden, output_dim, out_alloc=hidden)
    return {"w1": w1, "b1": b1, "w2": w2, "b2": b2, "w3": w3, "b3": b3}


def dqn_reference(x, p):
    """Pure-JAX reference with identical bf16-operand / f32-accum arithmetic."""
    out_dim = p["b3"].shape[-1]
    h = jnp.maximum(
        jnp.dot(x.astype(jnp.bfloat16), p["w1"],
                preferred_element_type=jnp.float32) + p["b1"], 0.0)
    h = jnp.maximum(
        jnp.dot(h.astype(jnp.bfloat16), p["w2"],
                preferred_element_type=jnp.float32) + p["b2"], 0.0)
    q = jnp.dot(h.astype(jnp.bfloat16), p["w3"],
                preferred_element_type=jnp.float32)
    return q[:, :out_dim] + p["b3"]


if __name__ == "__main__":
    key = jax.random.PRNGKey(0)
    k_param, k_x = jax.random.split(key)

    B, input_dim, output_dim = 8, 4, 2   # CartPole-sized DQN: state=4, actions=2
    params = init_dqn_params(k_param, input_dim, output_dim)
    x = jax.random.normal(k_x, (B, input_dim), jnp.float32)

    out = dqn_forward(x, params)
    out = jax.block_until_ready(out)

    ref = dqn_reference(x, params)
    assert out.shape == (B, output_dim)
    assert jnp.allclose(out, ref, atol=1e-3, rtol=1e-3), "mismatch vs reference"

    print("KERNEL_OK")
</pallas_src>

<mosaic_0001>
module attributes {stable_mosaic.version = 11 : i64} {
  func.func @dqn_kernel(%arg0: i32, %arg1: memref<16x4xf32, #tpu.memory_space<vmem>>, %arg2: memref<4x128xbf16, #tpu.memory_space<vmem>>, %arg3: memref<1x128xf32, #tpu.memory_space<vmem>>, %arg4: memref<128x128xbf16, #tpu.memory_space<vmem>>, %arg5: memref<1x128xf32, #tpu.memory_space<vmem>>, %arg6: memref<128x128xbf16, #tpu.memory_space<vmem>>, %arg7: memref<1x2xf32, #tpu.memory_space<vmem>>, %arg8: memref<16x2xf32, #tpu.memory_space<vmem>>) attributes {dimension_semantics = [#tpu.dimension_semantics<parallel>], iteration_bounds = array<i64: 1>, scalar_prefetch = 0 : i64, scratch_operands = 0 : i64, tpu.core_type = #tpu.core_type<tc>, window_params = [{transform_indices = @transform_0, window_bounds = array<i64: 16, 4>}, {pipeline_mode = #tpu.pipeline_mode<synchronous>, transform_indices = @transform_1, window_bounds = array<i64: 4, 128>}, {pipeline_mode = #tpu.pipeline_mode<synchronous>, transform_indices = @transform_2, window_bounds = array<i64: 1, 128>}, {pipeline_mode = #tpu.pipeline_mode<synchronous>, transform_indices = @transform_3, window_bounds = array<i64: 128, 128>}, {pipeline_mode = #tpu.pipeline_mode<synchronous>, transform_indices = @transform_4, window_bounds = array<i64: 1, 128>}, {pipeline_mode = #tpu.pipeline_mode<synchronous>, transform_indices = @transform_5, window_bounds = array<i64: 128, 128>}, {pipeline_mode = #tpu.pipeline_mode<synchronous>, transform_indices = @transform_6, window_bounds = array<i64: 1, 2>}, {transform_indices = @transform_7, window_bounds = array<i64: 16, 2>}]} {
    %c0 = arith.constant 0 : index
    %c0_0 = arith.constant 0 : index
    %0 = vector.load %arg1[%c0, %c0_0] : memref<16x4xf32, #tpu.memory_space<vmem>>, vector<16x4xf32>
    %1 = arith.truncf %0 : vector<16x4xf32> to vector<16x4xbf16>
    %c0_1 = arith.constant 0 : index
    %c0_2 = arith.constant 0 : index
    %2 = vector.load %arg2[%c0_1, %c0_2] : memref<4x128xbf16, #tpu.memory_space<vmem>>, vector<4x128xbf16>
    %cst = arith.constant dense<0.000000e+00> : vector<16x128xf32>
    %3 = tpu.matmul %1, %2, %cst {dimension_numbers = #tpu.dot_dimension_numbers<[1], [0], [0], [1], [0, 0, 1, 1], [], []>} : vector<16x4xbf16>, vector<4x128xbf16>, vector<16x128xf32> -> vector<16x128xf32>
    %c0_3 = arith.constant 0 : index
    %c0_4 = arith.constant 0 : index
    %4 = vector.load %arg3[%c0_3, %c0_4] : memref<1x128xf32, #tpu.memory_space<vmem>>, vector<1x128xf32>
    %5 = vector.broadcast %4 : vector<1x128xf32> to vector<16x128xf32>
    %6 = arith.addf %3, %5 : vector<16x128xf32>
    %cst_5 = arith.constant 0.000000e+00 : f32
    %7 = vector.broadcast %cst_5 : f32 to vector<16x128xf32>
    %8 = arith.maximumf %6, %7 : vector<16x128xf32>
    %9 = arith.truncf %8 : vector<16x128xf32> to vector<16x128xbf16>
    %c0_6 = arith.constant 0 : index
    %c0_7 = arith.constant 0 : index
    %10 = vector.load %arg4[%c0_6, %c0_7] : memref<128x128xbf16, #tpu.memory_space<vmem>>, vector<128x128xbf16>
    %cst_8 = arith.constant dense<0.000000e+00> : vector<16x128xf32>
    %11 = tpu.matmul %9, %10, %cst_8 {dimension_numbers = #tpu.dot_dimension_numbers<[1], [0], [0], [1], [0, 0, 1, 1], [], []>} : vector<16x128xbf16>, vector<128x128xbf16>, vector<16x128xf32> -> vector<16x128xf32>
    %c0_9 = arith.constant 0 : index
    %c0_10 = arith.constant 0 : index
    %12 = vector.load %arg5[%c0_9, %c0_10] : memref<1x128xf32, #tpu.memory_space<vmem>>, vector<1x128xf32>
    %13 = vector.broadcast %12 : vector<1x128xf32> to vector<16x128xf32>
    %14 = arith.addf %11, %13 : vector<16x128xf32>
    %cst_11 = arith.constant 0.000000e+00 : f32
    %15 = vector.broadcast %cst_11 : f32 to vector<16x128xf32>
    %16 = arith.maximumf %14, %15 : vector<16x128xf32>
    %17 = arith.truncf %16 : vector<16x128xf32> to vector<16x128xbf16>
    %c0_12 = arith.constant 0 : index
    %c0_13 = arith.constant 0 : index
    %18 = vector.load %arg6[%c0_12, %c0_13] : memref<128x128xbf16, #tpu.memory_space<vmem>>, vector<128x128xbf16>
    %cst_14 = arith.constant dense<0.000000e+00> : vector<16x128xf32>
    %19 = tpu.matmul %17, %18, %cst_14 {dimension_numbers = #tpu.dot_dimension_numbers<[1], [0], [0], [1], [0, 0, 1, 1], [], []>} : vector<16x128xbf16>, vector<128x128xbf16>, vector<16x128xf32> -> vector<16x128xf32>
    %20 = vector.extract_strided_slice %19 {offsets = [0, 0], sizes = [16, 2], strides = [1, 1]} : vector<16x128xf32> to vector<16x2xf32>
    %c0_15 = arith.constant 0 : index
    %c0_16 = arith.constant 0 : index
    %21 = vector.load %arg7[%c0_15, %c0_16] : memref<1x2xf32, #tpu.memory_space<vmem>>, vector<1x2xf32>
    %22 = vector.broadcast %21 : vector<1x2xf32> to vector<16x2xf32>
    %23 = arith.addf %20, %22 : vector<16x2xf32>
    %c0_17 = arith.constant 0 : index
    %c0_18 = arith.constant 0 : index
    %24 = vector.load %arg8[%c0_17, %c0_18] : memref<16x2xf32, #tpu.memory_space<vmem>>, vector<16x2xf32>
    tpu.vector_store %arg8[%c0_17, %c0_18], %23 {strides = array<i32>} : memref<16x2xf32, #tpu.memory_space<vmem>>, vector<16x2xf32>,
    return
  }
  func.func @transform_0(%arg0: i32) -> (i32, i32) {
    %c0_i32 = arith.constant 0 : i32
    %c0_i32_0 = arith.constant 0 : i32
    return %arg0, %c0_i32 : i32, i32
  }
  func.func @transform_1(%arg0: i32) -> (i32, i32) {
    %c0_i32 = arith.constant 0 : i32
    %c0_i32_0 = arith.constant 0 : i32
    %c0_i32_1 = arith.constant 0 : i32
    return %c0_i32, %c0_i32_0 : i32, i32
  }
  func.func @transform_2(%arg0: i32) -> (i32, i32) {
    %c0_i32 = arith.constant 0 : i32
    %c0_i32_0 = arith.constant 0 : i32
    %c0_i32_1 = arith.constant 0 : i32
    return %c0_i32, %c0_i32_0 : i32, i32
  }
  func.func @transform_3(%arg0: i32) -> (i32, i32) {
    %c0_i32 = arith.constant 0 : i32
    %c0_i32_0 = arith.constant 0 : i32
    %c0_i32_1 = arith.constant 0 : i32
    return %c0_i32, %c0_i32_0 : i32, i32
  }
  func.func @transform_4(%arg0: i32) -> (i32, i32) {
    %c0_i32 = arith.constant 0 : i32
    %c0_i32_0 = arith.constant 0 : i32
    %c0_i32_1 = arith.constant 0 : i32
    return %c0_i32, %c0_i32_0 : i32, i32
  }
  func.func @transform_5(%arg0: i32) -> (i32, i32) {
    %c0_i32 = arith.constant 0 : i32
    %c0_i32_0 = arith.constant 0 : i32
    %c0_i32_1 = arith.constant 0 : i32
    return %c0_i32, %c0_i32_0 : i32, i32
  }
  func.func @transform_6(%arg0: i32) -> (i32, i32) {
    %c0_i32 = arith.constant 0 : i32
    %c0_i32_0 = arith.constant 0 : i32
    %c0_i32_1 = arith.constant 0 : i32
    return %c0_i32, %c0_i32_0 : i32, i32
  }
  func.func @transform_7(%arg0: i32) -> (i32, i32) {
    %c0_i32 = arith.constant 0 : i32
    %c0_i32_0 = arith.constant 0 : i32
    return %arg0, %c0_i32 : i32, i32
  }
}

</mosaic_0001>

<bundles_post_ra>
// kernel: tpu_custom_call.1
= control target key start
LH: loop header
LB: loop body
LE: loop exit
PB: predicated region body
PF: predicated region fallthrough
CT: control target
= control target key end

     0   :  { %12 = vsyncpa [#allocation3], 0  ;;  %s629_s0 = inlined_call_operand.vmem [shape: f32[16,4], index: 0, kind: input, shape index: {}]   ;;  %s630_s1 = inlined_call_operand.vmem [shape: bf16[4,128], index: 1, kind: input, shape index: {}]   ;;  %s631_s2 = inlined_call_operand.vmem [shape: f32[1,128], index: 2, kind: input, shape index: {}]   ;;  %s632_s3 = inlined_call_operand.hbm [shape: bf16[128,128], index: 3, kind: input, shape index: {}]   ;;  %s633_s4 = inlined_call_operand.vmem [shape: f32[1,128], index: 4, kind: input, shape index: {}]   ;;  %s634_s5 = inlined_call_operand.hbm [shape: bf16[128,128], index: 5, kind: input, shape index: {}]   ;;  %s635_s6 = inlined_call_operand.vmem [shape: f32[1,2], index: 6, kind: input, shape index: {}]   ;;  %s636_s7 = inlined_call_operand.vmem [shape: f32[16,2], index: 7, kind: output, shape index: {}]  }
   0x1   :  { %13 = vsyncpa [#allocation5], 0  ;;  %s512_s24 = smov [#allocation2]   ;;  %s464_s28 = scalar_lea.hbm %s632_s3, 1024 }
   0x2   :  { %s25_s25 = sshll.u32 %s512_s24, 4  ;;  %p465_p0 = scmp.ne.s32.totalorder %s632_s3, %s464_s28  ;;  %s26_s25 = int_to_ptr.vmem [resolvable:$true] %s25_s25 }
   0x3   :  { %p468_p1 = scmp.lt.u32.totalorder %s464_s28, %s632_s3 }
   0x5   :  { %p470_p2 = pnand %p468_p1, %p465_p0 }
   0x7   :  { %473 = shalt.err (!%p470_p2)
}
   0x8   :  { %s474_s10 = scalar_lea.vmem %s26_s25, 1024  ;;  %p479_p4 = scmp.lt.s32.totalorder %s26_s25, %s26_s25 }
   0x9   :  { %p475_p3 = scmp.ne.s32.totalorder %s26_s25, %s474_s10  ;;  %p480_p5 = scmp.lt.s32.totalorder %s474_s10, %s474_s10 }
   0xb   :  { %p481_p6 = por %p480_p5, %p479_p4 }
   0xd   :  { %p482_p7 = pnand %p481_p6, %p475_p3 }
   0xf   :  { %485 = shalt.err (!%p482_p7)
}
  0x10   :  { %s513_s11 = smov 64   ;;  %s514_s12 = smov 4  }
  0x11   :  { %31 = dma.hbm_to_vmem [thread:$0]  %s632_s3, 1024, %s26_s25, [#allocation3], %s513_s11, %s513_s11, %s514_s12  }
  0x12   :  { %s515_s15 = smov [#allocation4]   ;;  %s486_s19 = scalar_lea.hbm %s634_s5, 1024 }
  0x13   :  { %s39_s16 = sshll.u32 %s515_s15, 4  ;;  %p487_p8 = scmp.ne.s32.totalorder %s634_s5, %s486_s19  ;;  %s40_s16 = int_to_ptr.vmem [resolvable:$true] %s39_s16 }
  0x14   :  { %p490_p9 = scmp.lt.u32.totalorder %s486_s19, %s634_s5 }
  0x16   :  { %p492_p10 = pnand %p490_p9, %p487_p8 }
  0x18   :  { %495 = shalt.err (!%p492_p10)
}
  0x19   :  { %s496_s24 = scalar_lea.vmem %s40_s16, 1024  ;;  %p501_p12 = scmp.lt.s32.totalorder %s40_s16, %s40_s16 }
  0x1a   :  { %p497_p11 = scmp.ne.s32.totalorder %s40_s16, %s496_s24  ;;  %p502_p13 = scmp.lt.s32.totalorder %s496_s24, %s496_s24 }
  0x1c   :  { %p503_p0 = por %p502_p13, %p501_p12 }
  0x1e   :  { %p504_p1 = pnand %p503_p0, %p497_p11 }
  0x20   :  { %507 = shalt.err (!%p504_p1)
}
  0x21   :  { %45 = dma.hbm_to_vmem [thread:$0]  %s634_s5, 1024, %s40_s16, [#allocation5], %s513_s11, %s513_s11, %s514_s12  }
  0x22   :  { %508 = dma.done.wait [#allocation3], 1024  }
  0x23   :  { %509 = vsyncadd [#allocation3], 4294966272 }
  0x24   :  { %510 = dma.done.wait [#allocation5], 1024  }
  0x25   :  { %511 = vsyncadd [#allocation5], 4294966272  ;;  %v516_v0 = vmov 0.0   ;;  %vm517_vm0 = vmmov 0   ;;  %vm70_vm1 = vcmask 1041408   ;;  %v55_v2 = vld [vmem:[%s629_s0] sm:$0xff] }
  0x26   :  { %396 = vmatprep.subr.bf16.mxu0 %v516_v0  ;;  %398 = vmatprep.mubr.msk.bf16.mxu0 %vm517_vm0, %v516_v0  ;;  %v58_v1 = vld [vmem:[%s630_s1] sm:$0x3]  ;;  %v56_v3 = vld [vmem:[%s629_s0 + $0x8] sm:$0xff]  ;;  %vm66_vm2 = vcmask 31744   ;;  %v450_v8 = vld [vmem:[#allocation2 + $0x10] sm:$0xff]   ;;  %vm347_vm3 = vcmask 15360  }
  0x27   :  { %402 = vmatprep.subr.bf16.mxu1 %v516_v0  ;;  %418 = vmatprep.mubr.msk.bf16.mxu1 %vm517_vm0, %v516_v0  ;;  %v72_v4 = vsel %vm70_vm1, %v58_v1, 0  ;;  %v57_v5 = vpack.c.bf16 %v56_v3, %v55_v2  ;;  %v448_v6 = vld [vmem:[#allocation2] sm:$0xff]   ;;  %v449_v7 = vld [vmem:[#allocation2 + $0x8] sm:$0xff]   ;;  %v451_v9 = vld [vmem:[#allocation2 + $0x18] sm:$0xff]  }
  0x28   :  { %397 = vmatpush3.bf16.msra.mxu0 %v72_v4  ;;  %403 = vmatpush3.bf16.msra.mxu1 %v448_v6  ;;  %v452_v10 = vld [vmem:[#allocation2 + $0x20] sm:$0xff]   ;;  %v453_v11 = vld [vmem:[#allocation2 + $0x28] sm:$0xff]   ;;  %v454_v12 = vld [vmem:[#allocation2 + $0x30] sm:$0xff]  }
  0x29   :  { %422 = vmatprep.subr.bf16.mxu0 %v516_v0  ;;  %404 = vmatprep.subr.bf16.mxu1 %v516_v0  ;;  %v455_v13 = vld [vmem:[#allocation2 + $0x38] sm:$0xff]   ;;  %v456_v14 = vld [vmem:[#allocation4] sm:$0xff]   ;;  %v457_v15 = vld [vmem:[#allocation4 + $0x8] sm:$0xff]  }
  0x2a   :  { %v458_v16 = vld [vmem:[#allocation4 + $0x10] sm:$0xff]   ;;  %v459_v17 = vld [vmem:[#allocation4 + $0x18] sm:$0xff]   ;;  %v460_v18 = vld [vmem:[#allocation4 + $0x20] sm:$0xff]  }
  0x2b   :  { %399 = vmatmul.mubr.msk.bf16.vlgmr.msra.gmra.mrb[0].mxu0 %vm66_vm2, %v57_v5  ;;  %v461_v19 = vld [vmem:[#allocation4 + $0x28] sm:$0xff]   ;;  %v356_v20 = vld [vmem:[%s631_s2] ss:$0 sm:$0xff]  ;;  %v462_v30 = vld [vmem:[#allocation4 + $0x30] sm:$0xff]  }
  0x2c   :  { %438 = vmatprep.mubr.msk.bf16.mxu0 %vm517_vm0, %v516_v0  ;;  %405 = vmatpush3.bf16.msra.mxu1 %v449_v7  ;;  %v463_v31 = vld [vmem:[#allocation4 + $0x38] sm:$0xff]   ;;  %v358_v32 = vld [vmem:[%s633_s4] ss:$0 sm:$0xff] }
  0x2d   :  { %406 = vmatprep.subr.bf16.mxu1 %v516_v0  ;;  %423 = vmatpush3.bf16.msra.mxu0 %v456_v14  ;;  %v375_v42 = vld [vmem:[%s635_s6] ss:$0 sm:$0xff] }
  0x2e   :  { %424 = vmatprep.subr.bf16.mxu0 %v516_v0 }
  0x30   :  { %407 = vmatpush3.bf16.msra.mxu1 %v450_v8 }
  0x31   :  { %408 = vmatprep.subr.bf16.mxu1 %v516_v0  ;;  %425 = vmatpush3.bf16.msra.mxu0 %v457_v15 }
  0x32   :  { %426 = vmatprep.subr.bf16.mxu0 %v516_v0 }
  0x34   :  { %409 = vmatpush3.bf16.msra.mxu1 %v451_v9 }
  0x35   :  { %410 = vmatprep.subr.bf16.mxu1 %v516_v0  ;;  %427 = vmatpush3.bf16.msra.mxu0 %v458_v16 }
  0x36   :  { %428 = vmatprep.subr.bf16.mxu0 %v516_v0 }
  0x38   :  { %411 = vmatpush3.bf16.msra.mxu1 %v452_v10 }
  0x39   :  { %412 = vmatprep.subr.bf16.mxu1 %v516_v0  ;;  %429 = vmatpush3.bf16.msra.mxu0 %v459_v17 }
  0x3a   :  { %430 = vmatprep.subr.bf16.mxu0 %v516_v0 }
  0x3c   :  { %413 = vmatpush3.bf16.msra.mxu1 %v453_v11 }
  0x3d   :  { %414 = vmatprep.subr.bf16.mxu1 %v516_v0  ;;  %431 = vmatpush3.bf16.msra.mxu0 %v460_v18 }
  0x3e   :  { %432 = vmatprep.subr.bf16.mxu0 %v516_v0 }
  0x40   :  { %415 = vmatpush3.bf16.msra.mxu1 %v454_v12 }
  0x41   :  { %416 = vmatprep.subr.bf16.mxu1 %v516_v0  ;;  %433 = vmatpush3.bf16.msra.mxu0 %v461_v19 }
  0x42   :  { %434 = vmatprep.subr.bf16.mxu0 %v516_v0 }
  0x44   :  { %417 = vmatpush3.bf16.msra.mxu1 %v455_v13 }
  0x45   :  { %435 = vmatpush3.bf16.msra.mxu0 %v462_v30 }
  0x46   :  { %436 = vmatprep.subr.bf16.mxu0 %v516_v0 }
  0x49   :  { %437 = vmatpush3.bf16.msra.mxu0 %v463_v31 }
  0xfe   :  { %v108_v21 = vpop.f32.mrb[0].mxu0 }
  0xff   :  { %v109_v22 = vadd.f32 %v356_v20, %v108_v21  ;;  %v400_v23 = vpop.f32.mrb[1].mxu0 }
 0x100   :  { %v111_v24 = vpop.f32.mrb[2].mxu0 }
 0x101   :  { %v112_v25 = vadd.f32 %v356_v20, %v111_v24  ;;  %v401_v26 = vpop.f32.mrb[3].mxu0  ;;  %v115_v27 = vmax.f32 %v109_v22, 0.0 }
 0x103   :  { %v116_v28 = vmax.f32 %v112_v25, 0.0 }
 0x105   :  { %v117_v29 = vpack.c.bf16 %v116_v28, %v115_v27 }
 0x107   :  { %419 = vmatmul.mubr.bf16.vlgmr.msra.gmra.mrb[0].mxu1 %v117_v29 }
 0x1da   :  { %v223_v33 = vpop.f32.mrb[0].mxu1 }
 0x1db   :  { %v224_v34 = vadd.f32 %v358_v32, %v223_v33  ;;  %v420_v35 = vpop.f32.mrb[1].mxu1 }
 0x1dc   :  { %v226_v36 = vpop.f32.mrb[2].mxu1 }
 0x1dd   :  { %v227_v37 = vadd.f32 %v358_v32, %v226_v36  ;;  %v421_v38 = vpop.f32.mrb[3].mxu1  ;;  %v230_v39 = vmax.f32 %v224_v34, 0.0 }
 0x1df   :  { %v231_v40 = vmax.f32 %v227_v37, 0.0 }
 0x1e1   :  { %v232_v41 = vpack.c.bf16 %v231_v40, %v230_v39 }
 0x1e3   :  { %439 = vmatmul.mubr.bf16.vlgmr.msra.gmra.mrb[4].mxu0 %v232_v41 }
 0x2b6   :  { %v331_v43 = vpop.f32.mrb[4].mxu0 }
 0x2b7   :  { %v345_v44 = vadd.f32 %v375_v42, %v331_v43  ;;  %v440_v45 = vpop.f32.mrb[5].mxu0 }
 0x2b8   :  { %v334_v46 = vpop.f32.mrb[6].mxu0 }
 0x2b9   :  { %348 = vst.msk [vmem:[%s636_s7] sm:$0xff] %vm347_vm3, %v345_v44  ;;  %v346_v47 = vadd.f32 %v375_v42, %v334_v46  ;;  %v441_v48 = vpop.f32.mrb[7].mxu0 }
 0x2bb   :  { %349 = vst.msk [vmem:[%s636_s7 + $0x8] sm:$0xff] %vm347_vm3, %v346_v47 }
 0x2bc   :  { %354 = vsyncpa [#allocation3], 1 }
 0x2bd   :  { %355 = vsyncpa [#allocation5], 1 }

</bundles_post_ra>
